<compile_context>
chip_gen: v7x
topology: tpu7x:2x2x1
jax: 0.10.0
libtpu: 0.0.40
codegen_flags: <defaults>
</compile_context>

<pallas_src>
from functools import partial

import jax
import jax.numpy as jnp
from jax import lax
from jax.experimental import pallas as pl
from jax.experimental.pallas import tpu as pltpu


# --------------------------------------------------------------------------
# Pallas kernel: one grid step = one batch image, single K=kh*kw*Cin matmul
# --------------------------------------------------------------------------
def _spconv_kernel(kh, kw, ho, wo, x_ref, w_ref, b_ref, o_ref):
    """
    x_ref : (H, W, Cin)            f32  full input plane of batch b
    w_ref : (kh*kw*Cin, Cout*r)    f32  packed weights (resident across grid)
    b_ref : (1, Cout*r)            f32  bias
    o_ref : (Ho*Wo, Cout*r)        f32  conv output rows for batch b
    """
    xv = x_ref[...]                                    # single load of the plane
    cin = xv.shape[-1]

    # In-kernel im2col: pack the kh*kw taps along the lane (channel) axis.
    # K index = (i*kw + j)*Cin + c  — must match the wrapper's weight packing.
    taps = [xv[i:i + ho, j:j + wo, :] for i in range(kh) for j in range(kw)]
    lhs = jnp.concatenate(taps, axis=-1)               # (Ho, Wo, kh*kw*Cin)
    lhs = lhs.reshape(ho * wo, kh * kw * cin)          # (M, K) — lane dim unchanged

    out = jnp.dot(lhs, w_ref[...], preferred_element_type=jnp.float32)
    o_ref[...] = out + b_ref[...]                      # fused bias, lane-dense store


def _conv_pallas(x_nhwc, w_packed, b2, kh, kw):
    """Valid conv, channels-last. Returns (B, Ho*Wo, Cout*r) f32."""
    B, H, W, Cin = x_nhwc.shape
    K, CoutR = w_packed.shape
    Ho, Wo = H - kh + 1, W - kw + 1

    kernel = partial(_spconv_kernel, kh, kw, Ho, Wo)
    return pl.pallas_call(
        kernel,
        out_shape=jax.ShapeDtypeStruct((B, Ho * Wo, CoutR), jnp.float32),
        grid=(B,),
        in_specs=[
            # full (H, W, Cin) plane of batch b
            pl.BlockSpec((None, H, W, Cin), lambda b: (b, 0, 0, 0)),
            # packed weights: constant block index -> DMA'd once, stays in VMEM
            pl.BlockSpec((K, CoutR), lambda b: (0, 0)),
            # bias: constant
            pl.BlockSpec((1, CoutR), lambda b: (0, 0)),
        ],
        out_specs=pl.BlockSpec((None, Ho * Wo, CoutR), lambda b: (b, 0, 0)),
        compiler_params=pltpu.CompilerParams(
            dimension_semantics=("parallel",)),        # batches across v7x cores
    )(x_nhwc, w_packed, b2)


# --------------------------------------------------------------------------
# Channels-last entry point (preferred if the surrounding model is NHWC)
# --------------------------------------------------------------------------
def sp_conv_transpose2d_nhwc(x_nhwc, weight, bias, r):
    """x_nhwc: [B, H, W, Cin] -> [B, Ho, Wo*r, Cout] (channels-last)."""
    B, H, W, Cin = x_nhwc.shape
    CoutR, _, kh, kw = weight.shape
    Cout = CoutR // r
    Ho, Wo = H - kh + 1, W - kw + 1

    # pack weights once: (i, j, c) -> K index (i*kw + j)*Cin + c
    w_packed = jnp.transpose(weight, (2, 3, 1, 0)).reshape(kh * kw * Cin, CoutR)
    b2 = bias.reshape(1, CoutR).astype(jnp.float32)

    y = _conv_pallas(x_nhwc.astype(jnp.float32),
                     w_packed.astype(jnp.float32), b2, kh, kw)

    # sub-pixel shuffle: conv channel n = ri*Cout + oc -> (width w*r + ri, channel oc)
    # (pure reshape on the channels-last result — no data shuffle)
    return y.reshape(B, Ho, Wo, r, Cout).reshape(B, Ho, Wo * r, Cout)


# --------------------------------------------------------------------------
# PyTorch-compatible NCHW wrapper
# --------------------------------------------------------------------------
@partial(jax.jit, static_argnames=("r",))
def sp_conv_transpose2d(x, weight, bias, r):
    """
    x      : [B, Cin, H, W]        float32 (NCHW, as in the PyTorch module)
    weight : [Cout*r, Cin, kh, kw] float32 (PyTorch Conv2d layout)
    bias   : [Cout*r]              float32
    returns: [B, Cout, H-kh+1, (W-kw+1)*r] float32
    """
    # Boundary transposes exist only for NCHW interface parity with PyTorch;
    # a channels-last model should call sp_conv_transpose2d_nhwc directly.
    y = sp_conv_transpose2d_nhwc(jnp.transpose(x, (0, 2, 3, 1)), weight, bias, r)
    return jnp.transpose(y, (0, 3, 1, 2))


# --------------------------------------------------------------------------
if __name__ == "__main__":
    key = jax.random.PRNGKey(0)
    k1, k2, k3 = jax.random.split(key, 3)

    # SPConvTranspose2d(in_channels=8, out_channels=64, kernel_size=(2, 3), r=2)
    B, Cin, H, W = 2, 8, 6, 18
    Cout, r = 64, 2
    kh, kw = 2, 3

    x = jax.random.normal(k1, (B, Cin, H, W), jnp.float32)
    weight = jax.random.normal(k2, (Cout * r, Cin, kh, kw), jnp.float32) * 0.05
    bias = jax.random.normal(k3, (Cout * r,), jnp.float32) * 0.02

    out = jax.block_until_ready(sp_conv_transpose2d(x, weight, bias, r))

    Ho, Wo = H - kh + 1, W - kw + 1
    assert out.shape == (B, Cout, Ho, Wo * r), out.shape
    assert bool(jnp.all(jnp.isfinite(out)))

    # pure-JAX f32 reference replicating the PyTorch module exactly
    ref = lax.conv_general_dilated(
        x, weight, window_strides=(1, 1), padding="VALID",
        dimension_numbers=("NCHW", "OIHW", "NCHW"))
    ref = ref + bias.reshape(1, Cout * r, 1, 1)
    ref = ref.reshape(B, r, Cout, Ho, Wo)
    ref = jnp.transpose(ref, (0, 2, 3, 4, 1)).reshape(B, Cout, Ho, Wo * r)

    err = float(jnp.max(jnp.abs(out - ref)))
    assert err < 5e-2, f"max abs err {err}"
    print("KERNEL_OK")
</pallas_src>

<mosaic_0001>
module attributes {stable_mosaic.version = 11 : i64} {
  func.func @_spconv_kernel(%arg0: i32, %arg1: memref<1x6x18x8xf32, #tpu.memory_space<vmem>>, %arg2: memref<48x128xf32, #tpu.memory_space<vmem>>, %arg3: memref<1x128xf32, #tpu.memory_space<vmem>>, %arg4: memref<1x80x128xf32, #tpu.memory_space<vmem>>) attributes {dimension_semantics = [#tpu.dimension_semantics<parallel>], iteration_bounds = array<i64: 2>, scalar_prefetch = 0 : i64, scratch_operands = 0 : i64, tpu.core_type = #tpu.core_type<tc>, window_params = [{transform_indices = @transform_0, window_bounds = array<i64: 1, 6, 18, 8>}, {pipeline_mode = #tpu.pipeline_mode<synchronous>, transform_indices = @transform_1, window_bounds = array<i64: 48, 128>}, {pipeline_mode = #tpu.pipeline_mode<synchronous>, transform_indices = @transform_2, window_bounds = array<i64: 1, 128>}, {transform_indices = @transform_3, window_bounds = array<i64: 1, 80, 128>}]} {
    %c0 = arith.constant 0 : index
    %c0_0 = arith.constant 0 : index
    %c0_1 = arith.constant 0 : index
    %c0_2 = arith.constant 0 : index
    %0 = vector.load %arg1[%c0, %c0_0, %c0_1, %c0_2] : memref<1x6x18x8xf32, #tpu.memory_space<vmem>>, vector<1x6x18x8xf32>
    %1 = vector.shape_cast %0 : vector<1x6x18x8xf32> to vector<6x18x8xf32>
    %2 = vector.extract_strided_slice %1 {offsets = [0, 0, 0], sizes = [5, 16, 8], strides = [1, 1, 1]} : vector<6x18x8xf32> to vector<5x16x8xf32>
    %3 = vector.extract_strided_slice %1 {offsets = [0, 1, 0], sizes = [5, 16, 8], strides = [1, 1, 1]} : vector<6x18x8xf32> to vector<5x16x8xf32>
    %4 = vector.extract_strided_slice %1 {offsets = [0, 2, 0], sizes = [5, 16, 8], strides = [1, 1, 1]} : vector<6x18x8xf32> to vector<5x16x8xf32>
    %5 = vector.extract_strided_slice %1 {offsets = [1, 0, 0], sizes = [5, 16, 8], strides = [1, 1, 1]} : vector<6x18x8xf32> to vector<5x16x8xf32>
    %6 = vector.extract_strided_slice %1 {offsets = [1, 1, 0], sizes = [5, 16, 8], strides = [1, 1, 1]} : vector<6x18x8xf32> to vector<5x16x8xf32>
    %7 = vector.extract_strided_slice %1 {offsets = [1, 2, 0], sizes = [5, 16, 8], strides = [1, 1, 1]} : vector<6x18x8xf32> to vector<5x16x8xf32>
    %8 = tpu.concatenate %2, %3, %4, %5, %6, %7 in 2 : vector<5x16x8xf32>, vector<5x16x8xf32>, vector<5x16x8xf32>, vector<5x16x8xf32>, vector<5x16x8xf32>, vector<5x16x8xf32> -> vector<5x16x48xf32>
    %9 = vector.shape_cast %8 : vector<5x16x48xf32> to vector<80x48xf32>
    %c0_3 = arith.constant 0 : index
    %c0_4 = arith.constant 0 : index
    %10 = vector.load %arg2[%c0_3, %c0_4] : memref<48x128xf32, #tpu.memory_space<vmem>>, vector<48x128xf32>
    %cst = arith.constant dense<0.000000e+00> : vector<80x128xf32>
    %11 = tpu.matmul %9, %10, %cst {dimension_numbers = #tpu.dot_dimension_numbers<[1], [0], [0], [1], [0, 0, 1, 1], [], []>} : vector<80x48xf32>, vector<48x128xf32>, vector<80x128xf32> -> vector<80x128xf32>
    %c0_5 = arith.constant 0 : index
    %c0_6 = arith.constant 0 : index
    %12 = vector.load %arg3[%c0_5, %c0_6] : memref<1x128xf32, #tpu.memory_space<vmem>>, vector<1x128xf32>
    %13 = vector.broadcast %12 : vector<1x128xf32> to vector<80x128xf32>
    %14 = arith.addf %11, %13 : vector<80x128xf32>
    %c0_7 = arith.constant 0 : index
    %c0_8 = arith.constant 0 : index
    %c0_9 = arith.constant 0 : index
    %15 = vector.load %arg4[%c0_7, %c0_8, %c0_9] : memref<1x80x128xf32, #tpu.memory_space<vmem>>, vector<1x80x128xf32>
    %16 = vector.shape_cast %15 : vector<1x80x128xf32> to vector<80x128xf32>
    %17 = vector.shape_cast %14 : vector<80x128xf32> to vector<1x80x128xf32>
    tpu.vector_store %arg4[%c0_7, %c0_8, %c0_9], %17 {strides = array<i32>} : memref<1x80x128xf32, #tpu.memory_space<vmem>>, vector<1x80x128xf32>,
    return
  }
  func.func @transform_0(%arg0: i32) -> (i32, i32, i32, i32) {
    %c0_i32 = arith.constant 0 : i32
    %c0_i32_0 = arith.constant 0 : i32
    %c0_i32_1 = arith.constant 0 : i32
    %c0_i32_2 = arith.constant 0 : i32
    return %arg0, %c0_i32, %c0_i32_0, %c0_i32_1 : i32, i32, i32, i32
  }
  func.func @transform_1(%arg0: i32) -> (i32, i32) {
    %c0_i32 = arith.constant 0 : i32
    %c0_i32_0 = arith.constant 0 : i32
    %c0_i32_1 = arith.constant 0 : i32
    return %c0_i32, %c0_i32_0 : i32, i32
  }
  func.func @transform_2(%arg0: i32) -> (i32, i32) {
    %c0_i32 = arith.constant 0 : i32
    %c0_i32_0 = arith.constant 0 : i32
    %c0_i32_1 = arith.constant 0 : i32
    return %c0_i32, %c0_i32_0 : i32, i32
  }
  func.func @transform_3(%arg0: i32) -> (i32, i32, i32) {
    %c0_i32 = arith.constant 0 : i32
    %c0_i32_0 = arith.constant 0 : i32
    %c0_i32_1 = arith.constant 0 : i32
    return %arg0, %c0_i32, %c0_i32_0 : i32, i32, i32
  }
}

</mosaic_0001>

<bundles_post_ra>
// kernel: sp_conv_transpose2d.1
= control target key start
LH: loop header
LB: loop body
LE: loop exit
PB: predicated region body
PF: predicated region fallthrough
CT: control target
= control target key end

     0   :  { %s827_s12 = smov 0   ;;  %s1119_s0 = inlined_call_operand.vmem [shape: f32[2,6,18,8], index: 0, kind: input, shape index: {}]   ;;  %s1120_s1 = inlined_call_operand.vmem [shape: f32[48,128], index: 1, kind: input, shape index: {}]   ;;  %s1121_s2 = inlined_call_operand.vmem [shape: f32[1,128], index: 2, kind: input, shape index: {}]   ;;  %s1122_s3 = inlined_call_operand.vmem [shape: f32[2,80,128], index: 3, kind: output, shape index: {}]  }
   0x1 LB: > { %s698_s13 = sadd.s32 4294967295, %s800_s12   ;;  %p702_p0 = scmp.ge.s32.totalorder %s800_s12, 1  ;;  %s800_s12 = sphi %s827_s12, %s13_s12  }
   0x2   : > { %p137_p1 = scmp.lt.s32.totalorder %s800_s12, 3 }
   0x4   : > { %p138_p2 = pnand %p702_p0, %p137_p1 }
   0x5   : > { %p161_p3 = scmp.lt.s32.totalorder (!%p138_p2), %s698_s13, 1  ;;  %vm260_vm0 = vcmask (!%p138_p2), 1045504   ;;  %s802_s18 = smov (!%p138_p2), 24   ;;  %vm204_vm1 = vcmask (!%p138_p2), 1046528   ;;  %v474_v28 = vld [vmem:[%s1120_s1] sm:$0xff] (!%p138_p2)  ;;  %v475_v29 = vld [vmem:[%s1120_s1 + $0x8] sm:$0xff] (!%p138_p2) }
   0x6   : > { %141 = sbr.rel (%p138_p2) target bundleno = 446 (0x1be), region = 32  ;;  %s803_s19 = smov (!%p138_p2), 16   ;;  %v476_v34 = vld [vmem:[%s1120_s1 + $0x10] sm:$0xff] (!%p138_p2)  ;;  %v477_v35 = vld [vmem:[%s1120_s1 + $0x18] sm:$0xff] (!%p138_p2)  ;;  %v761_v43 = vpack.c.bf16 (!%p138_p2), %v475_v29, %v474_v28  ;;  %v478_v48 = vld [vmem:[%s1120_s1 + $0x20] sm:$0xff] (!%p138_p2)  ;;  %vm419_vm2 = vcmask (!%p138_p2), 64512  }
   0x7   : > { %s804_s20 = smov (!%p138_p2), 8   ;;  %s805_s25 = smov (!%p138_p2), 32   ;;  %v765_v46 = vpack.c.bf16 (!%p138_p2), %v477_v35, %v476_v34  ;;  %v479_v49 = vld [vmem:[%s1120_s1 + $0x28] sm:$0xff] (!%p138_p2)  ;;  %vm430_vm3 = vcmask (!%p138_p2), 130048   ;;  %vm441_vm4 = vcmask (!%p138_p2), 195584   ;;  %vm452_vm5 = vcmask (!%p138_p2), 261120  }
   0x8   : > { %762 = vmatprep.subr.bf16.mxu0 (!%p138_p2), %v761_v43  ;;  %773 = vmatprep.subr.bf16.mxu1 (!%p138_p2), %v761_v43  ;;  %v769_v52 = vpack.c.bf16 (!%p138_p2), %v479_v49, %v478_v48  ;;  %s806_s7 = smov (!%p138_p2), 40   ;;  %vm463_vm6 = vcmask (!%p138_p2), 326656   ;;  %vm487_vm7 = vcmask (!%p138_p2), 392192  }
   0x9   : > { %764 = vmatpush3.bf16.msra.mxu0 (!%p138_p2), %v761_v43  ;;  %776 = vmatpush3.bf16.msra.mxu1 (!%p138_p2), %v761_v43 }
   0xa   : > { %766 = vmatprep.subr.bf16.mxu0 (!%p138_p2), %v765_v46  ;;  %774 = vmatprep.subr.bf16.mxu1 (!%p138_p2), %v765_v46 }
   0xd   : > { %s1124_s13 = smov (!%p161_p3, %s698_s13), 1  ;;  %768 = vmatpush3.bf16.msra.mxu0 %v765_v46  ;;  %777 = vmatpush3.bf16.msra.mxu1 %v765_v46 }
   0xe   : > { %s779_s14 = smul.u32 144, %s1124_s13  ;;  %770 = vmatprep.subr.bf16.mxu0 %v769_v52  ;;  %775 = vmatprep.subr.bf16.mxu1 %v769_v52 }
   0xf   : > { %s780_s8 = smul.u32 80, %s1124_s13 }
  0x10   : > { %s841_s17 = scalar_lea.vmem %s1119_s0, %s779_s14 }
  0x11   : > { %v844_v0 = vld [vmem:[%s841_s17 + $0x20] sm:$0xff]  ;;  %v847_v1 = vld [vmem:[%s841_s17 + $0x18] sm:$0xff]  ;;  %v857_v3 = vld [vmem:[%s841_s17 + $0x8] sm:$0xff]  ;;  %772 = vmatpush3.bf16.msra.mxu0 %v769_v52  ;;  %778 = vmatpush3.bf16.msra.mxu1 %v769_v52  ;;  %s170_s15 = scalar_lea.vmem %s1122_s3, %s780_s8 }
  0x12   : > { %v850_v2 = vld [vmem:[%s841_s17] sm:$0xff]  ;;  %320 = vrot.lane.b32.xlu1 %v844_v0, %s802_s18  ;;  %318 = vrot.lane.b32.xlu0 %v847_v1, %s802_s18  ;;  %v173_v6 = vld [vmem:[%s841_s17 + $0x10] sm:$0x3]  ;;  %v262_v7 = vrot.slane %v857_v3, 2  ;;  %v206_v8 = vrot.slane %v857_v3, 1  ;;  %v210_v15 = vrot.slane %v847_v1, 1 }
  0x13   : > { %v261_v4 = vrot.slane %v850_v2, 2  ;;  %v205_v5 = vrot.slane %v850_v2, 1  ;;  %v264_v9 = vrot.slane %v173_v6, 2  ;;  %v208_v10 = vrot.slane %v173_v6, 1  ;;  %v873_v17 = vld [vmem:[%s841_s17 + $0x28] sm:$0x3] }
  0x14   : > { %v211_v16 = vrot.slane %v844_v0, 1  ;;  %v876_v18 = vld [vmem:[%s841_s17 + $0x48] sm:$0xff]  ;;  %v879_v19 = vld [vmem:[%s841_s17 + $0x50] sm:$0xff]  ;;  %v213_v21 = vrot.slane %v873_v17, 1  ;;  %v888_v24 = vld [vmem:[%s841_s17 + $0x80] sm:$0xff]  ;;  %v266_v26 = vrot.slane %v847_v1, 2 }
  0x15   : > { %v263_v11 = vsel %vm260_vm0, %v261_v4, %v262_v7  ;;  %v207_v12 = vsel %vm204_vm1, %v205_v5, %v206_v8  ;;  %v265_v13 = vsel %vm260_vm0, %v262_v7, %v264_v9  ;;  %v209_v14 = vsel %vm204_vm1, %v206_v8, %v208_v10  ;;  %v188_v25 = vld [vmem:[%s841_s17 + $0x88] sm:$0x3]  ;;  %v893_v27 = vld [vmem:[%s841_s17 + $0x78] sm:$0xff]  ;;  %v963_v61 = vld [vmem:[%s841_s17 + $0x60] sm:$0xff] }
  0x16   : > { %286 = vrot.lane.b32.xlu1 %v263_v11, %s803_s19  ;;  %230 = vrot.lane.b32.xlu0 %v207_v12, %s804_s20  ;;  %v212_v20 = vsel %vm204_vm1, %v210_v15, %v211_v16  ;;  %v220_v22 = vrot.slane %v876_v18, 1  ;;  %v221_v23 = vrot.slane %v879_v19, 1  ;;  %v267_v30 = vrot.slane %v844_v0, 2  ;;  %v182_v40 = vld [vmem:[%s841_s17 + $0x58] sm:$0x3]  ;;  %v966_v62 = vld [vmem:[%s841_s17 + $0x30] sm:$0xff] }
  0x17   : > { %v349_v31 = vrot.slane %v893_v27, 1  ;;  %v384_v32 = vrot.slane %v893_v27, 2  ;;  %v350_v33 = vrot.slane %v888_v24, 1  ;;  %v214_v36 = vsel %vm204_vm1, %v211_v16, %v213_v21  ;;  %v969_v63 = vld [vmem:[%s841_s17 + $0x68] sm:$0xff]  ;;  %v972_v4 = vld [vmem:[%s841_s17 + $0x38] sm:$0xff] }
  0x18   : > { %v915_v37 = vsel %vm204_vm1, %v220_v22, %v221_v23  ;;  %v385_v38 = vrot.slane %v888_v24, 2  ;;  %v352_v39 = vrot.slane %v188_v25, 1  ;;  %v387_v42 = vrot.slane %v188_v25, 2  ;;  %v185_v11 = vld [vmem:[%s841_s17 + $0x70] sm:$0x3] }
  0x19   : > { %v920_v41 = vsel %vm204_vm1, %v349_v31, %v350_v33  ;;  %v268_v50 = vsel %vm260_vm0, %v266_v26, %v267_v30  ;;  %v223_v51 = vrot.slane %v182_v40, 1  ;;  %v269_v54 = vrot.slane %v873_v17, 2  ;;  %v179_v12 = vld [vmem:[%s841_s17 + $0x40] sm:$0x3] }
  0x1a   : > { %288 = vrot.lane.b32.xlu1 %v265_v13, %s803_s19  ;;  %232 = vrot.lane.b32.xlu0 %v209_v14, %s804_s20  ;;  %v923_v44 = vsel %vm204_vm1, %v350_v33, %v352_v39  ;;  %v926_v45 = vsel %vm260_vm0, %v384_v32, %v385_v38  ;;  %v932_v47 = vsel %vm260_vm0, %v385_v38, %v387_v42  ;;  %v276_v55 = vrot.slane %v876_v18, 2 }
  0x1b   : > { %v944_v53 = vsel %vm204_vm1, %v221_v23, %v223_v51  ;;  %v277_v56 = vrot.slane %v879_v19, 2  ;;  %v270_v57 = vsel %vm260_vm0, %v267_v30, %v269_v54  ;;  %v279_v59 = vrot.slane %v182_v40, 2 }
  0x1c   : > { %v225_v5 = vrot.slane %v963_v61, 1  ;;  %v226_v6 = vrot.slane %v969_v63, 1  ;;  %v215_v7 = vrot.slane %v966_v62, 1  ;;  %v216_v8 = vrot.slane %v972_v4, 1 }
  0x1d   : > { %v954_v58 = vsel %vm260_vm0, %v276_v55, %v277_v56  ;;  %v280_v60 = vsel %vm260_vm0, %v277_v56, %v279_v59  ;;  %v228_v13 = vrot.slane %v185_v11, 1  ;;  %v218_v14 = vrot.slane %v179_v12, 1 }
  0x1e   : > { %234 = vrot.lane.b32.xlu1 %v212_v20, %s804_s20  ;;  %354 = vrot.lane.b32.xlu0 %v212_v20, %s805_s25  ;;  %v227_v9 = vsel %vm204_vm1, %v225_v5, %v226_v6  ;;  %v217_v10 = vsel %vm204_vm1, %v215_v7, %v216_v8  ;;  %v281_v15 = vrot.slane %v963_v61, 2  ;;  %v282_v16 = vrot.slane %v969_v63, 2 }
  0x1f   : > { %v229_v17 = vsel %vm204_vm1, %v226_v6, %v228_v13  ;;  %v219_v20 = vsel %vm204_vm1, %v216_v8, %v218_v14  ;;  %v271_v21 = vrot.slane %v966_v62, 2  ;;  %v272_v22 = vrot.slane %v972_v4, 2 }
  0x20   : > { %v283_v23 = vsel %vm260_vm0, %v281_v15, %v282_v16  ;;  %v284_v26 = vrot.slane %v185_v11, 2  ;;  %v274_v28 = vrot.slane %v179_v12, 2 }
  0x21   : > { %v273_v25 = vsel %vm260_vm0, %v271_v21, %v272_v22 }
  0x22   : > { %356 = vrot.lane.b32.xlu1 %v214_v36, %s805_s25  ;;  %242 = vrot.lane.b32.xlu0 %v915_v37, %s804_s20  ;;  %v285_v29 = vsel %vm260_vm0, %v282_v16, %v284_v26  ;;  %v275_v30 = vsel %vm260_vm0, %v272_v22, %v274_v28 }
  0x26   : > { %236 = vrot.lane.b32.xlu1 %v214_v36, %s804_s20  ;;  %389 = vrot.lane.b32.xlu0 %v268_v50, %s806_s7 }
  0x2a   : > { %290 = vrot.lane.b32.xlu1 %v268_v50, %s803_s19  ;;  %244 = vrot.lane.b32.xlu0 %v944_v53, %s804_s20 }
  0x2e   : > { %391 = vrot.lane.b32.xlu1 %v270_v57, %s806_s7  ;;  %298 = vrot.lane.b32.xlu0 %v954_v58, %s803_s19 }
  0x32   : > { %300 = vrot.lane.b32.xlu1 %v280_v60, %s803_s19  ;;  %292 = vrot.lane.b32.xlu0 %v270_v57, %s803_s19 }
  0x36   : > { %330 = vrot.lane.b32.xlu1 %v963_v61, %s802_s18  ;;  %322 = vrot.lane.b32.xlu0 %v966_v62, %s802_s18 }
  0x3a   : > { %332 = vrot.lane.b32.xlu1 %v969_v63, %s802_s18  ;;  %324 = vrot.lane.b32.xlu0 %v972_v4, %s802_s18 }
  0x3e   : > { %366 = vrot.lane.b32.xlu1 %v227_v9, %s805_s25  ;;  %358 = vrot.lane.b32.xlu0 %v217_v10, %s805_s25 }
  0x42   : > { %246 = vrot.lane.b32.xlu1 %v227_v9, %s804_s20  ;;  %238 = vrot.lane.b32.xlu0 %v217_v10, %s804_s20 }
  0x46   : > { %368 = vrot.lane.b32.xlu1 %v229_v17, %s805_s25  ;;  %360 = vrot.lane.b32.xlu0 %v219_v20, %s805_s25 }
  0x4a   : > { %401 = vrot.lane.b32.xlu1 %v283_v23, %s806_s7  ;;  %393 = vrot.lane.b32.xlu0 %v273_v25, %s806_s7 }
  0x4e   : > { %248 = vrot.lane.b32.xlu1 %v229_v17, %s804_s20  ;;  %240 = vrot.lane.b32.xlu0 %v219_v20, %s804_s20 }
  0x52   : > { %302 = vrot.lane.b32.xlu1 %v283_v23, %s803_s19  ;;  %294 = vrot.lane.b32.xlu0 %v273_v25, %s803_s19 }
  0x56   : > { %403 = vrot.lane.b32.xlu1 %v285_v29, %s806_s7  ;;  %395 = vrot.lane.b32.xlu0 %v275_v30, %s806_s7 }
  0x5a   : > { %304 = vrot.lane.b32.xlu1 %v285_v29, %s803_s19  ;;  %296 = vrot.lane.b32.xlu0 %v275_v30, %s803_s19 }
  0x5e   : > { %334 = vrot.lane.b32.xlu1 %v893_v27, %s802_s18  ;;  %326 = vrot.lane.b32.xlu0 %v876_v18, %s802_s18 }
  0x62   : > { %336 = vrot.lane.b32.xlu1 %v888_v24, %s802_s18  ;;  %328 = vrot.lane.b32.xlu0 %v879_v19, %s802_s18 }
  0x66   : > { %370 = vrot.lane.b32.xlu1 %v920_v41, %s805_s25  ;;  %362 = vrot.lane.b32.xlu0 %v915_v37, %s805_s25 }
  0x6a   : > { %372 = vrot.lane.b32.xlu1 %v923_v44, %s805_s25  ;;  %364 = vrot.lane.b32.xlu0 %v944_v53, %s805_s25 }
  0x6e   : > { %405 = vrot.lane.b32.xlu1 %v926_v45, %s806_s7  ;;  %397 = vrot.lane.b32.xlu0 %v954_v58, %s806_s7 }
  0x72   : > { %407 = vrot.lane.b32.xlu1 %v932_v47, %s806_s7  ;;  %399 = vrot.lane.b32.xlu0 %v280_v60, %s806_s7 }
  0x84   : > { %v321_v24 = vpop.permute.xlu1 %320  ;;  %v319_v27 = vpop.permute.xlu0 %318 }
  0x88   : > { %v287_v31 = vpop.permute.xlu1 %286  ;;  %v231_v32 = vpop.permute.xlu0 %230 }
  0x89   : > { %v420_v37 = vsel %vm419_vm2, %v850_v2, %v231_v32 }
  0x8a   : > { %v431_v38 = vsel %vm430_vm3, %v420_v37, %v287_v31 }
  0x8b   : > { %v442_v41 = vsel %vm441_vm4, %v431_v38, %v319_v27 }
  0x8c   : > { %v289_v33 = vpop.permute.xlu1 %288  ;;  %v233_v34 = vpop.permute.xlu0 %232 }
  0x8d   : > { %v421_v45 = vsel %vm419_vm2, %v857_v3, %v233_v34 }
  0x8e   : > { %v432_v2 = vsel %vm430_vm3, %v421_v45, %v289_v33 }
  0x8f   : > { %v443_v49 = vsel %vm441_vm4, %v432_v2, %v321_v24 }
  0x90   : > { %v235_v35 = vpop.permute.xlu1 %234  ;;  %v355_v36 = vpop.permute.xlu0 %354 }
  0x91   : > { %v453_v42 = vsel %vm452_vm5, %v442_v41, %v355_v36  ;;  %v422_v9 = vsel %vm419_vm2, %v847_v1, %v235_v35 }
  0x94   : > { %v357_v39 = vpop.permute.xlu1 %356  ;;  %v243_v40 = vpop.permute.xlu0 %242 }
  0x95   : > { %v454_v50 = vsel %vm452_vm5, %v443_v49, %v357_v39  ;;  %v426_v10 = vsel %vm419_vm2, %v876_v18, %v243_v40 }
  0x98   : > { %v237_v43 = vpop.permute.xlu1 %236  ;;  %v390_v44 = vpop.permute.xlu0 %389 }
  0x99   : > { %v464_v46 = vsel %vm463_vm6, %v453_v42, %v390_v44  ;;  %v423_v26 = vsel %vm419_vm2, %v844_v0, %v237_v43 }
  0x9a   : > { %746 = vmatprep.mubr.msk.f32.mxu0 %vm487_vm7, %v464_v46 }
  0x9c   : > { %v291_v47 = vpop.permute.xlu1 %290  ;;  %v245_v48 = vpop.permute.xlu0 %244 }
  0x9d   : > { %v433_v11 = vsel %vm430_vm3, %v422_v9, %v291_v47  ;;  %v427_v28 = vsel %vm419_vm2, %v879_v19, %v245_v48 }
  0xa0   : > { %v392_v51 = vpop.permute.xlu1 %391  ;;  %v299_v52 = vpop.permute.xlu0 %298 }
  0xa1   : > { %v465_v53 = vsel %vm463_vm6, %v454_v50, %v392_v51  ;;  %v437_v12 = vsel %vm430_vm3, %v426_v10, %v299_v52 }
  0xa2   : > { %747 = vmatmul.mubr.msk.f32.vlgmr.msra.gmra.mrb[0].mxu0 %vm487_vm7, %v465_v53 }
  0xa4   : > { %v301_v54 = vpop.permute.xlu1 %300  ;;  %v293_v3 = vpop.permute.xlu0 %292 }
  0xa5   : > { %v438_v29 = vsel %vm430_vm3, %v427_v28, %v301_v54  ;;  %v434_v30 = vsel %vm430_vm3, %v423_v26, %v293_v3 }
  0xa8   : > { %v331_v55 = vpop.permute.xlu1 %330  ;;  %v323_v56 = vpop.permute.xlu0 %322 }
  0xa9   : > { %v448_v13 = vsel %vm441_vm4, %v437_v12, %v331_v55  ;;  %v444_v14 = vsel %vm441_vm4, %v433_v11, %v323_v56 }
  0xac   : > { %v333_v57 = vpop.permute.xlu1 %332  ;;  %v325_v58 = vpop.permute.xlu0 %324 }
  0xad   : > { %v449_v24 = vsel %vm441_vm4, %v438_v29, %v333_v57  ;;  %v445_v27 = vsel %vm441_vm4, %v434_v30, %v325_v58 }
  0xb0   : > { %v367_v59 = vpop.permute.xlu1 %366  ;;  %v359_v60 = vpop.permute.xlu0 %358 }
  0xb1   : > { %v459_v15 = vsel %vm452_vm5, %v448_v13, %v367_v59  ;;  %v455_v16 = vsel %vm452_vm5, %v444_v14, %v359_v60 }
  0xb4   : > { %v247_v5 = vpop.permute.xlu1 %246  ;;  %v239_v6 = vpop.permute.xlu0 %238 }
  0xb5   : > { %v428_v45 = vsel %vm419_vm2, %v963_v61, %v247_v5  ;;  %v424_v46 = vsel %vm419_vm2, %v966_v62, %v239_v6 }
  0xb8   : > { %v369_v7 = vpop.permute.xlu1 %368  ;;  %v361_v8 = vpop.permute.xlu0 %360 }
  0xb9   : > { %v460_v31 = vsel %vm452_vm5, %v449_v24, %v369_v7  ;;  %v456_v32 = vsel %vm452_vm5, %v445_v27, %v361_v8  ;;  %v705_v7 = vld [vmem:[%s1121_s2] ss:$0 sm:$0xff] }
  0xbc   : > { %v402_v17 = vpop.permute.xlu1 %401  ;;  %v394_v20 = vpop.permute.xlu0 %393 }
  0xbd   : > { %v466_v21 = vsel %vm463_vm6, %v455_v16, %v394_v20  ;;  %v470_v1 = vsel %vm463_vm6, %v459_v15, %v402_v17 }
  0xbe   : > { %749 = vmatprep.mubr.msk.f32.mxu0 %vm487_vm7, %v466_v21  ;;  %755 = vmatprep.mubr.msk.f32.mxu1 %vm487_vm7, %v470_v1 }
  0xc0   : > { %v249_v18 = vpop.permute.xlu1 %248  ;;  %v241_v22 = vpop.permute.xlu0 %240 }
  0xc1   : > { %v429_v61 = vsel %vm419_vm2, %v969_v63, %v249_v18  ;;  %v425_v62 = vsel %vm419_vm2, %v972_v4, %v241_v22 }
  0xc4   : > { %v303_v23 = vpop.permute.xlu1 %302  ;;  %v295_v25 = vpop.permute.xlu0 %294 }
  0xc5   : > { %v439_v2 = vsel %vm430_vm3, %v428_v45, %v303_v23  ;;  %v435_v47 = vsel %vm430_vm3, %v424_v46, %v295_v25 }
  0xc8   : > { %v404_v33 = vpop.permute.xlu1 %403  ;;  %v396_v34 = vpop.permute.xlu0 %395 }
  0xc9   : > { %v471_v35 = vsel %vm463_vm6, %v460_v31, %v404_v33  ;;  %v467_v0 = vsel %vm463_vm6, %v456_v32, %v396_v34 }
  0xca   : > { %750 = vmatmul.mubr.msk.f32.gmra.mrb[2].mxu0 %vm487_vm7, %v467_v0  ;;  %756 = vmatmul.mubr.msk.f32.vlgmr.msra.gmra.mrb[0].mxu1 %vm487_vm7, %v471_v35 }
  0xcc   : > { %v305_v19 = vpop.permute.xlu1 %304  ;;  %v297_v36 = vpop.permute.xlu0 %296 }
  0xcd   : > { %v440_v55 = vsel %vm430_vm3, %v429_v61, %v305_v19  ;;  %v436_v56 = vsel %vm430_vm3, %v425_v62, %v297_v36 }
  0xd0   : > { %v335_v37 = vpop.permute.xlu1 %334  ;;  %v327_v38 = vpop.permute.xlu0 %326 }
  0xd1   : > { %v450_v48 = vsel %vm441_vm4, %v439_v2, %v335_v37  ;;  %v446_v49 = vsel %vm441_vm4, %v435_v47, %v327_v38 }
  0xd4   : > { %v337_v39 = vpop.permute.xlu1 %336  ;;  %v329_v40 = vpop.permute.xlu0 %328 }
  0xd5   : > { %v451_v57 = vsel %vm441_vm4, %v440_v55, %v337_v39  ;;  %v447_v63 = vsel %vm441_vm4, %v436_v56, %v329_v40 }
  0xd8   : > { %v371_v41 = vpop.permute.xlu1 %370  ;;  %v363_v42 = vpop.permute.xlu0 %362 }
  0xd9   : > { %v461_v50 = vsel %vm452_vm5, %v450_v48, %v371_v41  ;;  %v457_v51 = vsel %vm452_vm5, %v446_v49, %v363_v42 }
  0xdc   : > { %v373_v43 = vpop.permute.xlu1 %372  ;;  %v365_v44 = vpop.permute.xlu0 %364 }
  0xdd   : > { %v462_v58 = vsel %vm452_vm5, %v451_v57, %v373_v43  ;;  %v458_v4 = vsel %vm452_vm5, %v447_v63, %v365_v44 }
  0xe0   : > { %v406_v52 = vpop.permute.xlu1 %405  ;;  %v398_v53 = vpop.permute.xlu0 %397 }
  0xe1   : > { %v472_v54 = vsel %vm463_vm6, %v461_v50, %v406_v52  ;;  %v468_v3 = vsel %vm463_vm6, %v457_v51, %v398_v53 }
  0xe2   : > { %752 = vmatprep.mubr.msk.f32.mxu0 %vm487_vm7, %v468_v3  ;;  %758 = vmatprep.mubr.msk.f32.mxu1 %vm487_vm7, %v472_v54 }
  0xe4   : > { %v408_v59 = vpop.permute.xlu1 %407  ;;  %v400_v60 = vpop.permute.xlu0 %399 }
  0xe5   : > { %v473_v5 = vsel %vm463_vm6, %v462_v58, %v408_v59  ;;  %v469_v6 = vsel %vm463_vm6, %v458_v4, %v400_v60 }
  0xe6   : > { %753 = vmatmul.mubr.msk.f32.gmra.mrb[4].mxu0 %vm487_vm7, %v469_v6  ;;  %759 = vmatmul.mubr.msk.f32.gmra.mrb[2].mxu1 %vm487_vm7, %v473_v5 }
 0x175   : > { %v748_v8 = vpop.f32.mrb[0].mxu0 }
 0x176   : > { %v590_v9 = vadd.f32 %v748_v8, %v705_v7  ;;  %v584_v10 = vpop.f32.mrb[1].mxu0 }
 0x177   : > { %v585_v11 = vadd.f32 %v705_v7, %v584_v10 }
 0x178   : > { %634 = vst [vmem:[%s170_s15 + $0x8] sm:$0xff] %v590_v9 }
 0x179   : > { %633 = vst [vmem:[%s170_s15] sm:$0xff] %v585_v11 }
 0x19d   : > { %v751_v12 = vpop.f32.mrb[2].mxu0  ;;  %v757_v13 = vpop.f32.mrb[0].mxu1 }
 0x19e   : > { %v600_v14 = vadd.f32 %v751_v12, %v705_v7  ;;  %v620_v15 = vadd.f32 %v757_v13, %v705_v7  ;;  %v594_v16 = vpop.f32.mrb[3].mxu0  ;;  %v614_v17 = vpop.f32.mrb[1].mxu1 }
 0x19f   : > { %v595_v20 = vadd.f32 %v705_v7, %v594_v16  ;;  %v615_v21 = vadd.f32 %v705_v7, %v614_v17 }
 0x1a0   : > { %636 = vst [vmem:[%s170_s15 + $0x18] sm:$0xff] %v600_v14  ;;  %640 = vst [vmem:[%s170_s15 + $0x38] sm:$0xff] %v620_v15 }
 0x1a1   : > { %635 = vst [vmem:[%s170_s15 + $0x10] sm:$0xff] %v595_v20  ;;  %639 = vst [vmem:[%s170_s15 + $0x30] sm:$0xff] %v615_v21 }
 0x1b9   : > { %v754_v1 = vpop.f32.mrb[4].mxu0  ;;  %v760_v18 = vpop.f32.mrb[2].mxu1 }
 0x1ba   : > { %v610_v22 = vadd.f32 %v754_v1, %v705_v7  ;;  %v630_v23 = vadd.f32 %v760_v18, %v705_v7  ;;  %v604_v25 = vpop.f32.mrb[5].mxu0  ;;  %v624_v26 = vpop.f32.mrb[3].mxu1 }
 0x1bb   : > { %v605_v28 = vadd.f32 %v705_v7, %v604_v25  ;;  %v625_v29 = vadd.f32 %v705_v7, %v624_v26 }
 0x1bc   : > { %638 = vst [vmem:[%s170_s15 + $0x28] sm:$0xff] %v610_v22  ;;  %642 = vst [vmem:[%s170_s15 + $0x48] sm:$0xff] %v630_v23 }
 0x1bd   : > { %637 = vst [vmem:[%s170_s15 + $0x20] sm:$0xff] %v605_v28  ;;  %641 = vst [vmem:[%s170_s15 + $0x40] sm:$0xff] %v625_v29 }
 0x1be PF: > { %s13_s12 = sadd.s32 1, %s800_s12  }
 0x1bf   : > { %p10_p4 = scmp.ge.s32.totalorder %s13_s12, 4  }
 0x1c1   :  { %12 = sbr.rel (!%p10_p4) target bundleno = 1 (0x1), region = 62 }

</bundles_post_ra>
